<compile_context>
chip_gen: v7x
topology: tpu7x:2x2x1
jax: 0.10.0
libtpu: 0.0.40
codegen_flags: <defaults>
</compile_context>

<pallas_src>
import functools

import jax
import jax.numpy as jnp
from jax.experimental import pallas as pl
from jax.experimental.pallas import tpu as pltpu


_LANE = 128
_SUB = 8
_SMALL_M = 256          # <= this many rows -> grid-less single-invocation path


def _round_up(v, m):
    return ((v + m - 1) // m) * m


def _linear_sub_kernel(x_ref, wt_ref, b_ref, o_ref):
    # out = x @ (w.T - I) + b   ( == x @ w.T + b - x for the square Linear )
    y = jnp.dot(
        x_ref[...],
        wt_ref[...],
        preferred_element_type=jnp.float32,
        precision=jax.lax.Precision.HIGHEST,
    )
    o_ref[...] = (y + b_ref[...]).astype(o_ref.dtype)


def prepare_params(w, b):
    """One-time parameter preprocessing (keep OUT of the per-call hot path).

    Returns (wt_pad, bp_pad):
      wt_pad: (Dp, Dp) = pad(w.T - I), lane-dense
      bp_pad: (1, Dp)  = pad(b)
    """
    d_out, d_in = w.shape
    if d_in != d_out:
        raise ValueError("forward `linear(x) - x` requires in_features == out_features")
    d = d_in
    dp = _round_up(d, _LANE)
    # Fold the residual subtraction into the weight.
    wt = w.T - jnp.eye(d, dtype=w.dtype)
    wt_pad = jnp.zeros((dp, dp), w.dtype).at[:d, :d].set(wt)
    bp_pad = jnp.zeros((1, dp), b.dtype).at[0, :d].set(b)
    return wt_pad, bp_pad


def _pick_tm(m_padded, dp, dtype_bytes=4):
    """Row-tile size for the tiled path, sized from a v7x-safe VMEM budget."""
    budget = 40 * 1024 * 1024                       # leave headroom under 64 MiB (v7x)
    w_bytes = 2 * dp * dp * dtype_bytes             # weight (possibly double-buffered)
    avail = max(budget - w_bytes, 2 * 1024 * 1024)
    tm_cap = avail // (4 * dp * dtype_bytes)        # 2x double-buffered (in + out) tiles
    tm_cap = max(_SUB, (tm_cap // _SUB) * _SUB)
    tm = 1024 if m_padded >= 4096 else 512          # bigger tiles amortize per-step cost
    tm = min(tm, tm_cap)
    # Guarantee >= 2 grid steps so v7x's second TensorCore gets work.
    if pl.cdiv(m_padded, tm) < 2:
        tm = max(_SUB, _round_up((m_padded + 1) // 2, _SUB))
    return tm


@functools.partial(jax.jit, static_argnames=("d_out",))
def linear_sub(x, wt_pad, bp_pad, *, d_out):
    """Computes linear(x) - x == x @ w.T + b - x using preprocessed params."""
    orig_shape = x.shape
    if x.ndim > 2:
        x = x.reshape(-1, x.shape[-1])              # flatten leading dims -> tall LHS
    m, d = x.shape
    if d != d_out:
        raise ValueError("feature dim mismatch")
    dp = wt_pad.shape[0]

    flops = 2 * m * dp * dp + m * dp
    bytes_accessed = 4 * (2 * m * dp + dp * dp + dp)

    if m <= _SMALL_M:
        # Small problem: single invocation, everything resident in VMEM.
        # Only the feature dim of x is padded (guarantees the K contraction
        # never reads undefined padding); rows stay unpadded/unsliced.
        xk = x if d == dp else jnp.pad(x, ((0, 0), (0, dp - d)))
        out = pl.pallas_call(
            _linear_sub_kernel,
            out_shape=jax.ShapeDtypeStruct((m, dp), x.dtype),
            in_specs=[
                pl.BlockSpec(memory_space=pltpu.MemorySpace.VMEM),
                pl.BlockSpec(memory_space=pltpu.MemorySpace.VMEM),
                pl.BlockSpec(memory_space=pltpu.MemorySpace.VMEM),
            ],
            out_specs=pl.BlockSpec(memory_space=pltpu.MemorySpace.VMEM),
            cost_estimate=pl.CostEstimate(
                flops=flops, transcendentals=0, bytes_accessed=bytes_accessed),
        )(xk, wt_pad, bp_pad)
    else:
        # Scaling path: tile only M; weight/bias stay resident (constant index_map).
        m8 = _round_up(m, _SUB)
        tm = _pick_tm(m8, dp)
        mp = _round_up(m, tm)                        # exact multiple of tm, zero-padded rows
        grid_m = mp // tm
        xp = jnp.pad(x, ((0, mp - m), (0, dp - d)))
        out = pl.pallas_call(
            _linear_sub_kernel,
            out_shape=jax.ShapeDtypeStruct((mp, dp), x.dtype),
            grid=(grid_m,),
            in_specs=[
                pl.BlockSpec((tm, dp), lambda i: (i, 0)),
                pl.BlockSpec((dp, dp), lambda i: (0, 0)),   # fetched once, stays resident
                pl.BlockSpec((1, dp), lambda i: (0, 0)),
            ],
            out_specs=pl.BlockSpec((tm, dp), lambda i: (i, 0)),
            compiler_params=pltpu.CompilerParams(
                dimension_semantics=("parallel",),          # megacore-shardable on v7x
                vmem_limit_bytes=56 * 1024 * 1024,          # explicit, safe on all gens
            ),
            cost_estimate=pl.CostEstimate(
                flops=flops, transcendentals=0, bytes_accessed=bytes_accessed),
        )(xp, wt_pad, bp_pad)

    out = out[:m, :d_out]
    if len(orig_shape) > 2:
        out = out.reshape(orig_shape[:-1] + (d_out,))
    return out


def reference(x, w, b):
    return jnp.dot(x, w.T, precision=jax.lax.Precision.HIGHEST) + b - x


if __name__ == "__main__":
    # Shapes consistent with the module: batch=5, features=50
    # (square Linear so `linear(x) - x` is well-defined).
    M, D = 5, 50

    key = jax.random.PRNGKey(0)
    kx, kw, kb = jax.random.split(key, 3)

    x = jax.random.normal(kx, (M, D), dtype=jnp.float32)

    # PyTorch-style Linear init: U(-1/sqrt(fan_in), 1/sqrt(fan_in))
    bound = 1.0 / jnp.sqrt(jnp.float32(D))
    w = jax.random.uniform(kw, (D, D), dtype=jnp.float32, minval=-bound, maxval=bound)
    b = jax.random.uniform(kb, (D,), dtype=jnp.float32, minval=-bound, maxval=bound)

    # One-time parameter preprocessing (out of the per-call hot path).
    wt_pad, bp_pad = prepare_params(w, b)

    # Small (grid-less) path.
    out = jax.block_until_ready(linear_sub(x, wt_pad, bp_pad, d_out=D))
    ref = reference(x, w, b)
    assert out.shape == (M, D)
    assert jnp.allclose(out, ref, atol=1e-4, rtol=1e-4), "mismatch vs reference (small path)"

    # Exercise the tiled (large-M) scaling path once as well.
    M2 = 1024
    x2 = jax.random.normal(jax.random.PRNGKey(1), (M2, D), dtype=jnp.float32)
    out2 = jax.block_until_ready(linear_sub(x2, wt_pad, bp_pad, d_out=D))
    ref2 = reference(x2, w, b)
    assert out2.shape == (M2, D)
    assert jnp.allclose(out2, ref2, atol=1e-4, rtol=1e-4), "mismatch vs reference (tiled path)"

    print("KERNEL_OK")
</pallas_src>

<mosaic_0001>
module attributes {stable_mosaic.version = 11 : i64} {
  func.func @_linear_sub_kernel(%arg0: memref<5x128xf32, #tpu.memory_space<vmem>>, %arg1: memref<128x128xf32, #tpu.memory_space<vmem>>, %arg2: memref<1x128xf32, #tpu.memory_space<vmem>>, %arg3: memref<5x128xf32, #tpu.memory_space<vmem>>) attributes {dimension_semantics = [], scalar_prefetch = 0 : i64, scratch_operands = 0 : i64, tpu.core_type = #tpu.core_type<tc>} {
    %c0 = arith.constant 0 : index
    %c0_0 = arith.constant 0 : index
    %0 = vector.load %arg0[%c0, %c0_0] : memref<5x128xf32, #tpu.memory_space<vmem>>, vector<5x128xf32>
    %c0_1 = arith.constant 0 : index
    %c0_2 = arith.constant 0 : index
    %1 = vector.load %arg1[%c0_1, %c0_2] : memref<128x128xf32, #tpu.memory_space<vmem>>, vector<128x128xf32>
    %cst = arith.constant dense<0.000000e+00> : vector<5x128xf32>
    %2 = tpu.matmul %0, %1, %cst {dimension_numbers = #tpu.dot_dimension_numbers<[1], [0], [0], [1], [0, 0, 1, 1], [], []>, precision = #tpu.contract_precision<fp32>} : vector<5x128xf32>, vector<128x128xf32>, vector<5x128xf32> -> vector<5x128xf32>
    %c0_3 = arith.constant 0 : index
    %c0_4 = arith.constant 0 : index
    %3 = vector.load %arg2[%c0_3, %c0_4] : memref<1x128xf32, #tpu.memory_space<vmem>>, vector<1x128xf32>
    %4 = vector.broadcast %3 : vector<1x128xf32> to vector<5x128xf32>
    %5 = arith.addf %2, %4 : vector<5x128xf32>
    %c0_5 = arith.constant 0 : index
    %c0_6 = arith.constant 0 : index
    %6 = vector.load %arg3[%c0_5, %c0_6] : memref<5x128xf32, #tpu.memory_space<vmem>>, vector<5x128xf32>
    tpu.vector_store %arg3[%c0_5, %c0_6], %5 {strides = array<i32>} : memref<5x128xf32, #tpu.memory_space<vmem>>, vector<5x128xf32>,
    return
  }
}

</mosaic_0001>

<bundles_post_ra>
// kernel: linear_sub.1
= control target key start
LH: loop header
LB: loop body
LE: loop exit
PB: predicated region body
PF: predicated region fallthrough
CT: control target
= control target key end

     0   :  { %8 = vsyncpa [#allocation3], 0  ;;  %s1536_s0 = inlined_call_operand.vmem [shape: f32[5,128], index: 0, kind: input, shape index: {}]   ;;  %s1537_s1 = inlined_call_operand.hbm [shape: f32[128,128], index: 1, kind: input, shape index: {}]   ;;  %s1538_s2 = inlined_call_operand.vmem [shape: f32[1,128], index: 2, kind: input, shape index: {}]   ;;  %s1539_s3 = inlined_call_operand.hbm [shape: f32[5,128], index: 3, kind: output, shape index: {}]  }
   0x1   :  { %9 = vsyncpa [#allocation4], 0  ;;  %s1232_s12 = smov [#allocation2]   ;;  %s1184_s16 = scalar_lea.hbm %s1537_s1, 2048 }
   0x2   :  { %s17_s13 = sshll.u32 %s1232_s12, 4  ;;  %p1185_p0 = scmp.ne.s32.totalorder %s1537_s1, %s1184_s16  ;;  %s18_s13 = int_to_ptr.vmem [resolvable:$true] %s17_s13 }
   0x3   :  { %p1188_p1 = scmp.lt.u32.totalorder %s1184_s16, %s1537_s1 }
   0x5   :  { %p1190_p2 = pnand %p1188_p1, %p1185_p0 }
   0x7   :  { %1193 = shalt.err (!%p1190_p2)
}
   0x8   :  { %s1194_s21 = scalar_lea.vmem %s18_s13, 2048  ;;  %p1199_p4 = scmp.lt.s32.totalorder %s18_s13, %s18_s13 }
   0x9   :  { %p1195_p3 = scmp.ne.s32.totalorder %s18_s13, %s1194_s21  ;;  %p1200_p5 = scmp.lt.s32.totalorder %s1194_s21, %s1194_s21 }
   0xb   :  { %p1201_p6 = por %p1200_p5, %p1199_p4 }
   0xd   :  { %p1202_p7 = pnand %p1201_p6, %p1195_p3 }
   0xf   :  { %1205 = shalt.err (!%p1202_p7)
}
  0x10   :  { %s1233_s22 = smov 128   ;;  %s1234_s23 = smov 8  }
  0x11   :  { %23 = dma.hbm_to_vmem [thread:$0]  %s1537_s1, 2048, %s18_s13, [#allocation3], %s1233_s22, %s1233_s22, %s1234_s23  }
  0x12   :  { %1228 = dma.done.wait [#allocation3], 2048  }
  0x13   :  { %1229 = vsyncadd [#allocation3], 4294965248  ;;  %v1235_v0 = vmov 0.0|0.0   ;;  %vm1236_vm0 = vmmov 0   ;;  %v1237_v1 = vmov 0.0   ;;  %v30_v2 = vld [vmem:[#allocation2] sm:$0xff] }
  0x14   :  { %1023 = vmatprep.subr.bf16.mxu1 %v1235_v0  ;;  %1095 = vmatprep.subr.bf16.mxu0 %v1235_v0  ;;  %v31_v3 = vld [vmem:[#allocation2 + $0x8] sm:$0xff]  ;;  %v32_v4 = vld [vmem:[#allocation2 + $0x10] sm:$0xff]  ;;  %v54_v5 = vand.u32 4294901760, %v30_v2  ;;  %v33_v7 = vld [vmem:[#allocation2 + $0x18] sm:$0xff]  ;;  %s1238_s28 = smov [#allocation5]  }
  0x15   :  { %845 = vmatprep.mubr.msk.f32.mxu1 %vm1236_vm0, %v1237_v1  ;;  %950 = vmatprep.mubr.msk.f32.mxu0 %vm1236_vm0, %v1237_v1  ;;  %v57_v6 = vand.u32 4294901760, %v31_v3  ;;  %v60_v8 = vand.u32 4294901760, %v32_v4  ;;  %v63_v9 = vand.u32 4294901760, %v33_v7  ;;  %v34_v10 = vld [vmem:[#allocation2 + $0x20] sm:$0xff]  ;;  %v35_v11 = vld [vmem:[#allocation2 + $0x28] sm:$0xff]  ;;  %v36_v16 = vld [vmem:[#allocation2 + $0x30] sm:$0xff] }
  0x16   :  { %v66_v14 = vand.u32 4294901760, %v34_v10  ;;  %v69_v15 = vand.u32 4294901760, %v35_v11  ;;  %v37_v17 = vld [vmem:[#allocation2 + $0x38] sm:$0xff]  ;;  %v72_v19 = vand.u32 4294901760, %v36_v16  ;;  %v1291_v21 = vld [vmem:[#allocation2 + $0x40] sm:$0xff]  ;;  %v1293_v22 = vld [vmem:[#allocation2 + $0x48] sm:$0xff]  ;;  %v1310_v29 = vsub.f32 %v30_v2, %v54_v5 }
  0x17   :  { %v1277_v12 = vpack.c.bf16 %v57_v6, %v54_v5  ;;  %v1281_v13 = vpack.c.bf16 %v63_v9, %v60_v8  ;;  %v75_v20 = vand.u32 4294901760, %v37_v17  ;;  %v78_v24 = vand.u32 4294901760, %v1291_v21  ;;  %v29_v26 = vld [vmem:[%s1536_s0] sm:$0x1f]  ;;  %v1306_v27 = vld [vmem:[#allocation2 + $0x50] sm:$0xff]  ;;  %v1322_v35 = vld [vmem:[#allocation2 + $0x60] sm:$0xff] }
  0x18   :  { %v1287_v18 = vpack.c.bf16 %v69_v15, %v66_v14  ;;  %v81_v25 = vand.u32 4294901760, %v1293_v22  ;;  %v1308_v28 = vld [vmem:[#allocation2 + $0x58] sm:$0xff]  ;;  %v1312_v30 = vand.u32 4294901760, %v29_v26  ;;  %v1314_v31 = vsub.f32 %v31_v3, %v57_v6  ;;  %v1326_v36 = vld [vmem:[#allocation2 + $0x68] sm:$0xff]  ;;  %v1345_v43 = vld [vmem:[#allocation2 + $0x70] sm:$0xff]  ;;  %s701_s29 = sshll.u32 %s1238_s28, 4  ;;  %s702_s29 = int_to_ptr.vmem [resolvable:$true] %s701_s29 }
  0x19   :  { %1025 = vmatpush3.bf16.msra.mxu1 %v1277_v12  ;;  %1097 = vmatpush3.bf16.msra.mxu0 %v1277_v12  ;;  %v1297_v23 = vpack.c.bf16 %v75_v20, %v72_v19  ;;  %v84_v33 = vand.u32 4294901760, %v1306_v27  ;;  %v87_v34 = vand.u32 4294901760, %v1308_v28  ;;  %v1328_v37 = vsub.f32 %v32_v4, %v60_v8  ;;  %v1347_v44 = vld [vmem:[#allocation2 + $0x78] sm:$0xff]  ;;  %s1206_s30 = scalar_lea.vmem %s702_s29, 128  ;;  %p1211_p9 = scmp.lt.s32.totalorder %s702_s29, %s702_s29 }
  0x1a   :  { %1026 = vmatprep.subr.bf16.mxu1 %v1235_v0  ;;  %1098 = vmatprep.subr.bf16.mxu0 %v1235_v0  ;;  %v1318_v32 = vpack.c.bf16 %v81_v25, %v78_v24  ;;  %v1330_v38 = vsub.f32 %v33_v7, %v63_v9  ;;  %v90_v39 = vand.u32 4294901760, %v1322_v35  ;;  %v1334_v40 = vsub.f32 %v29_v26, %v1312_v30  ;;  %p1207_p8 = scmp.ne.s32.totalorder %s702_s29, %s1206_s30  ;;  %p1212_p10 = scmp.lt.s32.totalorder %s1206_s30, %s1206_s30 }
  0x1b   :  { %v1342_v41 = vpack.c.bf16 %v87_v34, %v84_v33  ;;  %v93_v42 = vand.u32 4294901760, %v1326_v36  ;;  %v147_v45 = vand.u32 4294901760, %v1310_v29  ;;  %v154_v46 = vand.u32 4294901760, %v1314_v31 }
  0x1c   :  { %v1353_v47 = vsub.f32 %v34_v10, %v66_v14  ;;  %v1355_v48 = vsub.f32 %v35_v11, %v69_v15  ;;  %v96_v49 = vand.u32 4294901760, %v1345_v43  ;;  %v99_v50 = vand.u32 4294901760, %v1347_v44  ;;  %p1213_p11 = por %p1212_p10, %p1211_p9 }
  0x1d   :  { %1028 = vmatpush3.bf16.msra.mxu1 %v1281_v13  ;;  %1100 = vmatpush3.bf16.msra.mxu0 %v1281_v13  ;;  %v136_v51 = vand.u32 4294901760, %v1334_v40  ;;  %v161_v52 = vand.u32 4294901760, %v1328_v37  ;;  %v1367_v53 = vpack.c.bf16 %v93_v42, %v90_v39  ;;  %v148_v54 = vsub.f32 %v1310_v29, %v147_v45 }
  0x1e   :  { %1029 = vmatprep.subr.bf16.mxu1 %v1235_v0  ;;  %1101 = vmatprep.subr.bf16.mxu0 %v1235_v0  ;;  %v155_v55 = vsub.f32 %v1314_v31, %v154_v46  ;;  %v168_v56 = vand.u32 4294901760, %v1330_v38  ;;  %v1374_v57 = vsub.f32 %v36_v16, %v72_v19  ;;  %v1376_v58 = vsub.f32 %v37_v17, %v75_v20  ;;  %p1214_p12 = pnand %p1213_p11, %p1207_p8 }
  0x1f   :  { %v137_v59 = vsub.f32 %v1334_v40, %v136_v51  ;;  %v162_v60 = vsub.f32 %v1328_v37, %v161_v52  ;;  %v175_v61 = vand.u32 4294901760, %v1353_v47  ;;  %v182_v62 = vand.u32 4294901760, %v1355_v48 }
  0x20   :  { %v1388_v63 = vpack.c.bf16 %v99_v50, %v96_v49  ;;  %v149_v2 = vand.u32 4294901760, %v148_v54  ;;  %v156_v3 = vand.u32 4294901760, %v155_v55  ;;  %v169_v4 = vsub.f32 %v1330_v38, %v168_v56 }
  0x21   :  { %1031 = vmatpush3.bf16.msra.mxu1 %v1287_v18  ;;  %1103 = vmatpush3.bf16.msra.mxu0 %v1287_v18  ;;  %v1394_v5 = vsub.f32 %v1291_v21, %v78_v24  ;;  %v1397_v6 = vsub.f32 %v1293_v22, %v81_v25  ;;  %v1120_v7 = vpack.c.bf16 %v154_v46, %v147_v45  ;;  %v138_v8 = vand.u32 4294901760, %v137_v59 }
  0x22   :  { %1032 = vmatprep.subr.bf16.mxu1 %v1235_v0  ;;  %1104 = vmatprep.subr.bf16.mxu0 %v1235_v0  ;;  %v163_v9 = vand.u32 4294901760, %v162_v60  ;;  %v176_v10 = vsub.f32 %v1353_v47, %v175_v61  ;;  %v183_v11 = vsub.f32 %v1355_v48, %v182_v62  ;;  %v1048_v14 = vpack.c.bf16 %v156_v3, %v149_v2 }
  0x23   :  { %v170_v15 = vand.u32 4294901760, %v169_v4  ;;  %v189_v16 = vand.u32 4294901760, %v1374_v57  ;;  %v196_v17 = vand.u32 4294901760, %v1376_v58  ;;  %v1410_v19 = vsub.f32 %v1306_v27, %v84_v33 }
  0x24   :  { %v1415_v20 = vsub.f32 %v1308_v28, %v87_v34  ;;  %v1123_v21 = vpack.c.bf16 %v168_v56, %v161_v52  ;;  %v177_v22 = vand.u32 4294901760, %v176_v10  ;;  %v184_v24 = vand.u32 4294901760, %v183_v11 }
  0x25   :  { %1034 = vmatpush3.bf16.msra.mxu1 %v1297_v23  ;;  %1106 = vmatpush3.bf16.msra.mxu0 %v1297_v23  ;;  %v203_v25 = vand.u32 4294901760, %v1394_v5  ;;  %v1051_v26 = vpack.c.bf16 %v170_v15, %v163_v9  ;;  %v190_v45 = vsub.f32 %v1374_v57, %v189_v16  ;;  %v197_v27 = vsub.f32 %v1376_v58, %v196_v17 }
  0x26   :  { %1035 = vmatprep.subr.bf16.mxu1 %v1235_v0  ;;  %1107 = vmatprep.subr.bf16.mxu0 %v1235_v0  ;;  %v210_v33 = vand.u32 4294901760, %v1397_v6  ;;  %v1426_v28 = vsub.f32 %v1322_v35, %v90_v39  ;;  %v1431_v34 = vsub.f32 %v1326_v36, %v93_v42  ;;  %v1054_v46 = vpack.c.bf16 %v184_v24, %v177_v22 }
  0x27   :  { %v204_v52 = vsub.f32 %v1394_v5, %v203_v25  ;;  %v217_v54 = vand.u32 4294901760, %v1410_v19  ;;  %v191_v35 = vand.u32 4294901760, %v190_v45  ;;  %v198_v39 = vand.u32 4294901760, %v197_v27 }
  0x28   :  { %v211_v55 = vsub.f32 %v1397_v6, %v210_v33  ;;  %v224_v36 = vand.u32 4294901760, %v1415_v20  ;;  %v1446_v42 = vsub.f32 %v1345_v43, %v96_v49  ;;  %v1451_v56 = vsub.f32 %v1347_v44, %v99_v50 }
  0x29   :  { %1037 = vmatpush3.bf16.msra.mxu1 %v1318_v32  ;;  %1109 = vmatpush3.bf16.msra.mxu0 %v1318_v32  ;;  %v1129_v59 = vpack.c.bf16 %v196_v17, %v189_v16  ;;  %v205_v60 = vand.u32 4294901760, %v204_v52  ;;  %v1057_v2 = vpack.c.bf16 %v198_v39, %v191_v35  ;;  %v238_v43 = vand.u32 4294901760, %v1431_v34 }
  0x2a   :  { %1038 = vmatprep.subr.bf16.mxu1 %v1235_v0  ;;  %1110 = vmatprep.subr.bf16.mxu0 %v1235_v0  ;;  %v212_v3 = vand.u32 4294901760, %v211_v55  ;;  %v225_v4 = vsub.f32 %v1415_v20, %v224_v36  ;;  %v1132_v44 = vpack.c.bf16 %v210_v33, %v203_v25  ;;  %v252_v11 = vand.u32 4294901760, %v1451_v56 }
  0x2b   :  { %v239_v10 = vsub.f32 %v1431_v34, %v238_v43 }
  0x2c   :  { %v226_v9 = vand.u32 4294901760, %v225_v4  ;;  %v253_v22 = vsub.f32 %v1451_v56, %v252_v11 }
  0x2d   :  { %1040 = vmatpush3.bf16.msra.mxu1 %v1342_v41  ;;  %1112 = vmatpush3.bf16.msra.mxu0 %v1342_v41  ;;  %v240_v17 = vand.u32 4294901760, %v239_v10 }
  0x2e   :  { %1041 = vmatprep.subr.bf16.mxu1 %v1235_v0  ;;  %1113 = vmatprep.subr.bf16.mxu0 %v1235_v0  ;;  %v254_v45 = vand.u32 4294901760, %v253_v22 }
  0x31   :  { %1043 = vmatpush3.bf16.msra.mxu1 %v1367_v53  ;;  %1115 = vmatpush3.bf16.msra.mxu0 %v1367_v53 }
  0x32   :  { %1044 = vmatprep.subr.bf16.mxu1 %v1235_v0  ;;  %1116 = vmatprep.subr.bf16.mxu0 %v1235_v0 }
  0x35   :  { %1046 = vmatpush3.bf16.msra.mxu1 %v1388_v63  ;;  %1118 = vmatpush3.bf16.msra.mxu0 %v1388_v63 }
  0x36   :  { %1047 = vmatprep.subr.bf16.mxu1 %v1235_v0  ;;  %1119 = vmatprep.subr.bf16.mxu0 %v1235_v0 }
  0x38   :  { %846 = vmatmul.mubr.f32.vlgmr.msra.gmra.mrb[0].mxu1 %v138_v8  ;;  %951 = vmatmul.mubr.f32.vlgmr.msra.gmra.mrb[0].mxu0 %v136_v51  ;;  %v1126_v51 = vpack.c.bf16 %v182_v62, %v175_v61  ;;  %v218_v61 = vsub.f32 %v1410_v19, %v217_v54  ;;  %v231_v62 = vand.u32 4294901760, %v1426_v28  ;;  %v1060_v8 = vpack.c.bf16 %v212_v3, %v205_v60 }
  0x39   :  { %1049 = vmatpush3.bf16.msra.mxu1 %v1048_v14  ;;  %1121 = vmatpush3.bf16.msra.mxu0 %v1120_v7  ;;  %v245_v7 = vand.u32 4294901760, %v1446_v42  ;;  %v1135_v14 = vpack.c.bf16 %v224_v36, %v217_v54 }
  0x3a   :  { %1050 = vmatprep.subr.bf16.mxu1 %v1235_v0  ;;  %1122 = vmatprep.subr.bf16.mxu0 %v1235_v0  ;;  %v219_v49 = vand.u32 4294901760, %v218_v61  ;;  %v232_v50 = vsub.f32 %v1426_v28, %v231_v62  ;;  %v1138_v25 = vpack.c.bf16 %v238_v43, %v231_v62 }
  0x3b   :  { %880 = vmatprep.mubr.msk.f32.mxu1 %vm1236_vm0, %v1237_v1  ;;  %985 = vmatprep.mubr.msk.f32.mxu0 %vm1236_vm0, %v1237_v1  ;;  %v1141_v33 = vpack.c.bf16 %v252_v11, %v245_v7 }
  0x3c   :  { %v233_v15 = vand.u32 4294901760, %v232_v50  ;;  %v1063_v16 = vpack.c.bf16 %v226_v9, %v219_v49 }
  0x3d   :  { %1052 = vmatpush3.bf16.msra.mxu1 %v1051_v26  ;;  %1124 = vmatpush3.bf16.msra.mxu0 %v1123_v21  ;;  %v246_v21 = vsub.f32 %v1446_v42, %v245_v7 }
  0x3e   :  { %1053 = vmatprep.subr.bf16.mxu1 %v1235_v0  ;;  %1125 = vmatprep.subr.bf16.mxu0 %v1235_v0  ;;  %v1066_v24 = vpack.c.bf16 %v240_v17, %v233_v15 }
  0x3f   :  { %v247_v26 = vand.u32 4294901760, %v246_v21 }
  0x41   :  { %1055 = vmatpush3.bf16.msra.mxu1 %v1054_v46  ;;  %1127 = vmatpush3.bf16.msra.mxu0 %v1126_v51  ;;  %v1069_v27 = vpack.c.bf16 %v254_v45, %v247_v26  ;;  %v1072_v46 = vpack.c.bf16 %v1314_v31, %v1310_v29  ;;  %v1075_v51 = vpack.c.bf16 %v1330_v38, %v1328_v37  ;;  %v710_v31 = vld [vmem:[%s1538_s2] ss:$0 sm:$0xff] }
  0x42   :  { %1056 = vmatprep.subr.bf16.mxu1 %v1235_v0  ;;  %1128 = vmatprep.subr.bf16.mxu0 %v1235_v0  ;;  %v1078_v29 = vpack.c.bf16 %v1355_v48, %v1353_v47 }
  0x45   :  { %1058 = vmatpush3.bf16.msra.mxu1 %v1057_v2  ;;  %1130 = vmatpush3.bf16.msra.mxu0 %v1129_v59 }
  0x46   :  { %1059 = vmatprep.subr.bf16.mxu1 %v1235_v0  ;;  %1131 = vmatprep.subr.bf16.mxu0 %v1235_v0 }
  0x49   :  { %1061 = vmatpush3.bf16.msra.mxu1 %v1060_v8  ;;  %1133 = vmatpush3.bf16.msra.mxu0 %v1132_v44 }
  0x4a   :  { %1062 = vmatprep.subr.bf16.mxu1 %v1235_v0  ;;  %1134 = vmatprep.subr.bf16.mxu0 %v1235_v0 }
  0x4d   :  { %1064 = vmatpush3.bf16.msra.mxu1 %v1063_v16  ;;  %1136 = vmatpush3.bf16.msra.mxu0 %v1135_v14 }
  0x4e   :  { %1065 = vmatprep.subr.bf16.mxu1 %v1235_v0  ;;  %1137 = vmatprep.subr.bf16.mxu0 %v1235_v0 }
  0x51   :  { %1067 = vmatpush3.bf16.msra.mxu1 %v1066_v24  ;;  %1139 = vmatpush3.bf16.msra.mxu0 %v1138_v25 }
  0x52   :  { %1068 = vmatprep.subr.bf16.mxu1 %v1235_v0  ;;  %1140 = vmatprep.subr.bf16.mxu0 %v1235_v0 }
  0x55   :  { %1070 = vmatpush3.bf16.msra.mxu1 %v1069_v27  ;;  %1142 = vmatpush3.bf16.msra.mxu0 %v1141_v33 }
  0x56   :  { %1071 = vmatprep.subr.bf16.mxu1 %v1235_v0  ;;  %1143 = vmatprep.subr.bf16.mxu0 %v1235_v0 }
  0x58   :  { %881 = vmatmul.mubr.f32.vlgmr.msra.gmra.mrb[0].mxu1 %v1312_v30  ;;  %986 = vmatmul.mubr.f32.vlgmr.msra.gmra.mrb[0].mxu0 %v1312_v30 }
  0x59   :  { %1073 = vmatpush3.bf16.msra.mxu1 %v1072_v46  ;;  %1145 = vmatpush3.bf16.msra.mxu0 %v1277_v12  ;;  %v1081_v12 = vpack.c.bf16 %v1376_v58, %v1374_v57 }
  0x5a   :  { %1074 = vmatprep.subr.bf16.mxu1 %v1235_v0  ;;  %1146 = vmatprep.subr.bf16.mxu0 %v1235_v0 }
  0x5b   :  { %915 = vmatprep.mubr.msk.f32.mxu1 %vm1236_vm0, %v1237_v1  ;;  %1020 = vmatprep.mubr.msk.f32.mxu0 %vm1236_vm0, %v1237_v1  ;;  %v1084_v1 = vpack.c.bf16 %v1397_v6, %v1394_v5 }
  0x5d   :  { %1076 = vmatpush3.bf16.msra.mxu1 %v1075_v51  ;;  %1148 = vmatpush3.bf16.msra.mxu0 %v1281_v13  ;;  %v1087_v13 = vpack.c.bf16 %v1415_v20, %v1410_v19 }
  0x5e   :  { %1077 = vmatprep.subr.bf16.mxu1 %v1235_v0  ;;  %1149 = vmatprep.subr.bf16.mxu0 %v1235_v0 }
  0x61   :  { %1079 = vmatpush3.bf16.msra.mxu1 %v1078_v29  ;;  %1151 = vmatpush3.bf16.msra.mxu0 %v1287_v18  ;;  %v1090_v18 = vpack.c.bf16 %v1431_v34, %v1426_v28 }
  0x62   :  { %1080 = vmatprep.subr.bf16.mxu1 %v1235_v0  ;;  %1152 = vmatprep.subr.bf16.mxu0 %v1235_v0 }
  0x65   :  { %1082 = vmatpush3.bf16.msra.mxu1 %v1081_v12  ;;  %1154 = vmatpush3.bf16.msra.mxu0 %v1297_v23  ;;  %v1093_v23 = vpack.c.bf16 %v1451_v56, %v1446_v42 }
  0x66   :  { %1083 = vmatprep.subr.bf16.mxu1 %v1235_v0  ;;  %1155 = vmatprep.subr.bf16.mxu0 %v1235_v0 }
  0x69   :  { %1085 = vmatpush3.bf16.msra.mxu1 %v1084_v1  ;;  %1157 = vmatpush3.bf16.msra.mxu0 %v1318_v32 }
  0x6a   :  { %1086 = vmatprep.subr.bf16.mxu1 %v1235_v0  ;;  %1158 = vmatprep.subr.bf16.mxu0 %v1235_v0 }
  0x6d   :  { %1088 = vmatpush3.bf16.msra.mxu1 %v1087_v13  ;;  %1160 = vmatpush3.bf16.msra.mxu0 %v1342_v41 }
  0x6e   :  { %1089 = vmatprep.subr.bf16.mxu1 %v1235_v0  ;;  %1161 = vmatprep.subr.bf16.mxu0 %v1235_v0 }
  0x71   :  { %1091 = vmatpush3.bf16.msra.mxu1 %v1090_v18  ;;  %1163 = vmatpush3.bf16.msra.mxu0 %v1367_v53 }
  0x72   :  { %1092 = vmatprep.subr.bf16.mxu1 %v1235_v0  ;;  %1164 = vmatprep.subr.bf16.mxu0 %v1235_v0 }
  0x75   :  { %1094 = vmatpush3.bf16.msra.mxu1 %v1093_v23  ;;  %1166 = vmatpush3.bf16.msra.mxu0 %v1388_v63 }
  0x78   :  { %916 = vmatmul.mubr.f32.vlgmr.msra.gmra.mrb[0].mxu1 %v1334_v40  ;;  %1021 = vmatmul.mubr.f32.vlgmr.msra.gmra.mrb[0].mxu0 %v1312_v30 }
 0x14b   :  { %v395_v32 = vpop.f32.mrb[0].mxu1  ;;  %v690_v37 = vpop.f32.mrb[0].mxu0 }
 0x14c   :  { %v1167_v38 = vadd.f32 %v710_v31, %v395_v32  ;;  %v917_v41 = vpop.f32.mrb[1].mxu1  ;;  %v1022_v47 = vpop.f32.mrb[1].mxu0 }
 0x14e   :  { %v1168_v48 = vadd.f32 %v1167_v38, %v690_v37 }
 0x150   :  { %694 = vst [vmem:[#allocation5] sm:$0x1f] %v1168_v48 }
 0x151   :  { %1217 = shalt.err (!%p1214_p12)
}
 0x152   :  { %s1218_s2 = scalar_lea.hbm %s1539_s3, 128 }
 0x153   :  { %p1219_p13 = scmp.ne.s32.totalorder %s1539_s3, %s1218_s2  ;;  %p1222_p0 = scmp.lt.u32.totalorder %s1218_s2, %s1539_s3 }
 0x155   :  { %p1224_p1 = pnand %p1222_p0, %p1219_p13 }
 0x157   :  { %1227 = shalt.err (!%p1224_p1)
}
 0x158   :  { %704 = dma.vmem_to_hbm [thread:$0]  %s702_s29, 128, %s1539_s3, [#allocation4]  }
 0x159   :  { %1230 = dma.done.wait [#allocation4], 128  }
 0x15a   :  { %1231 = vsyncadd [#allocation4], 4294967168 }
 0x15b   :  { %708 = vsyncpa [#allocation3], 1 }
 0x15c   :  { %709 = vsyncpa [#allocation4], 1 }

</bundles_post_ra>
